<compile_context>
chip_gen: v6e
topology: v6e:2x2x1
jax: 0.10.0
libtpu: 0.0.40
codegen_flags: <defaults>
</compile_context>

<pallas_src>
import functools
import math

import jax
import jax.numpy as jnp
from jax.experimental import pallas as pl
from jax.experimental.pallas import tpu as pltpu

HIDDEN = 128


# ----------------------------- Pallas kernel --------------------------------
def dueling_dqn_kernel(x_ref, w0_ref, w1_ref, wh_ref, b_ref, o_ref,
                       *, batch, num_actions):
    # Lane-aligned static slices of the fused bias row (free views).
    b0 = b_ref[:, 0:HIDDEN]                # [1, 128]
    b1 = b_ref[:, HIDDEN:3 * HIDDEN]       # [1, 256]  (= [bv1 | ba1])
    bh = b_ref[:, 3 * HIDDEN:4 * HIDDEN]   # [1, 128]

    x = x_ref[...]                                                   # [Bp, F]

    # h = relu(x @ W0 + b0)        (W0 pre-transposed to [F, 128])
    h = jnp.dot(x, w0_ref[...], preferred_element_type=jnp.float32)
    h = jnp.maximum(h + b0, 0.0)                                     # [Bp, 128]

    # Fused value/advantage hidden layers: W1 = [wv1^T | wa1^T] -> [128, 256]
    g = jnp.dot(h, w1_ref[...], preferred_element_type=jnp.float32)
    g = jnp.maximum(g + b1, 0.0)                                     # [Bp, 256]

    # Fused block-structured head [256, 128]:
    #   rows   0..127 (value stream): wv2 replicated across ALL 128 lanes
    #   rows 128..255 (adv stream)  : wa2 in lanes 0..A-1, zeros elsewhere
    # => head[:, j] = v + a_j  for j < A ;  head[:, j] = v  for j >= A.
    head = jnp.dot(g, wh_ref[...], preferred_element_type=jnp.float32) + bh

    # Global advantage mean over the *real* B x A region only:
    #   sum_{i<B, j<A} (v_i + a_ij) - A * sum_{i<B} v_i  =  sum(a)
    # Single masked reduction; no [Bp,1] cross-lane broadcast anywhere.
    row_ids = jax.lax.broadcasted_iota(jnp.int32, head.shape, 0)
    col_ids = jax.lax.broadcasted_iota(jnp.int32, head.shape, 1)
    real_row = row_ids < batch
    adv_mask = real_row & (col_ids < num_actions)
    val_mask = real_row & (col_ids == HIDDEN - 1)          # lane 127 = pure v
    weights = (adv_mask.astype(jnp.float32)
               - float(num_actions) * val_mask.astype(jnp.float32))
    adv_mean = jnp.sum(head * weights) / (batch * num_actions)

    # Lanes 0..A-1 hold q_j = v + a_j - mean(a); extra lanes / padded rows are
    # sliced off outside the kernel. Pure VPU epilogue (scalar splat).
    o_ref[...] = head - adv_mean


def dueling_dqn_forward(x, fused, *, num_outputs):
    """Ungridded single-block pallas_call; returns the real [B, A] slice."""
    B, _ = x.shape
    Bp = -(-B // 8) * 8                    # pad batch to a sublane multiple
    if Bp != B:
        x = jnp.pad(x, ((0, Bp - B), (0, 0)))

    args = (x, fused["w0t"], fused["w1"], fused["whead"], fused["bias"])

    kernel = functools.partial(dueling_dqn_kernel,
                               batch=B, num_actions=num_outputs)

    # TODO(synk): for large batches on v6e/v7x, cast x / w0t / w1 / whead to
    # bfloat16 host-side (pad Bp to 16), keep f32 accumulation + f32 epilogue,
    # and split Bp over a leading "parallel" grid axis; at tiny B this forward
    # is launch-latency-bound and is best fused into the surrounding jit.
    out = pl.pallas_call(
        kernel,
        out_shape=jax.ShapeDtypeStruct((Bp, HIDDEN), jnp.float32),
        in_specs=[pl.BlockSpec(memory_space=pltpu.MemorySpace.VMEM)
                  for _ in args],
        out_specs=pl.BlockSpec(memory_space=pltpu.MemorySpace.VMEM),
    )(*args)

    return out[:B, :num_outputs]


# --------------------------- Parameter construction --------------------------
def _scale_noise(key, size):
    x = jax.random.normal(key, (size,), dtype=jnp.float32)
    return jnp.sign(x) * jnp.sqrt(jnp.abs(x))


def make_noisy_linear(key, in_features, out_features, std_init=0.1):
    """Effective (weight, bias) = (mu + sigma*eps, bias_mu + bias_sigma*eps)."""
    k_wmu, k_bmu, k_ein, k_eout, k_beps = jax.random.split(key, 5)
    mu_range = 1.0 / math.sqrt(in_features)

    weight_mu = jax.random.uniform(k_wmu, (out_features, in_features),
                                   minval=-mu_range, maxval=mu_range,
                                   dtype=jnp.float32)
    weight_sigma = jnp.full((out_features, in_features),
                            std_init / math.sqrt(in_features), jnp.float32)
    bias_mu = jax.random.uniform(k_bmu, (out_features,),
                                 minval=-mu_range, maxval=mu_range,
                                 dtype=jnp.float32)
    bias_sigma = jnp.full((out_features,),
                          std_init / math.sqrt(out_features), jnp.float32)

    eps_in = _scale_noise(k_ein, in_features)
    eps_out = _scale_noise(k_eout, out_features)
    weight_eps = jnp.outer(eps_out, eps_in)
    bias_eps = _scale_noise(k_beps, out_features)

    weight = weight_mu + weight_sigma * weight_eps
    bias = bias_mu + bias_sigma * bias_eps
    return weight, bias.reshape(1, out_features)


def make_linear(key, in_features, out_features):
    k_w, k_b = jax.random.split(key)
    bound = 1.0 / math.sqrt(in_features)
    w = jax.random.uniform(k_w, (out_features, in_features),
                           minval=-bound, maxval=bound, dtype=jnp.float32)
    b = jax.random.uniform(k_b, (out_features,),
                           minval=-bound, maxval=bound, dtype=jnp.float32)
    return w, b.reshape(1, out_features)


def make_params(key, num_inputs, num_outputs):
    k0, k1, k2, k3, k4 = jax.random.split(key, 5)
    w0, b0 = make_linear(k0, num_inputs, HIDDEN)
    wv1, bv1 = make_noisy_linear(k1, HIDDEN, HIDDEN)
    wv2, bv2 = make_noisy_linear(k2, HIDDEN, 1)
    wa1, ba1 = make_noisy_linear(k3, HIDDEN, HIDDEN)
    wa2, ba2 = make_noisy_linear(k4, HIDDEN, num_outputs)
    return dict(w0=w0, b0=b0, wv1=wv1, bv1=bv1, wv2=wv2, bv2=bv2,
                wa1=wa1, ba1=ba1, wa2=wa2, ba2=ba2)


def fuse_params(p, num_outputs):
    """Host-side: pre-transpose and fuse weights into MXU-friendly layouts."""
    A = num_outputs
    assert A <= 126, "fused head layout needs num_outputs <= 126 (value lane 127)"

    w0t = p["w0"].T                                          # [F, 128]

    # Hidden streams fused along the output (lane) axis.
    w1 = jnp.concatenate([p["wv1"].T, p["wa1"].T], axis=1)   # [128, 256]

    # Block-structured fused head [256, 128]:
    #   value column replicated across all 128 lanes (no in-kernel broadcast),
    #   advantage weights in lanes 0..A-1 of the lower block, lane 127 = pure v.
    wv_rep = jnp.tile(p["wv2"].T, (1, HIDDEN))               # [128, 128]
    wa_blk = jnp.zeros((HIDDEN, HIDDEN), jnp.float32).at[:, :A].set(p["wa2"].T)
    whead = jnp.concatenate([wv_rep, wa_blk], axis=0)        # [256, 128]

    bhead = jnp.full((1, HIDDEN), p["bv2"][0, 0], jnp.float32)
    bhead = bhead.at[0, :A].add(p["ba2"][0])

    # Single fused bias row: [b0 | bv1 | ba1 | bhead] -> [1, 512]
    bias = jnp.concatenate([p["b0"], p["bv1"], p["ba1"], bhead], axis=1)

    return dict(w0t=w0t, w1=w1, whead=whead, bias=bias)


# ------------------------------ Reference (JAX) ------------------------------
def reference_forward(x, p):
    h = jax.nn.relu(x @ p["w0"].T + p["b0"])
    v = jax.nn.relu(h @ p["wv1"].T + p["bv1"]) @ p["wv2"].T + p["bv2"]
    a = jax.nn.relu(h @ p["wa1"].T + p["ba1"]) @ p["wa2"].T + p["ba2"]
    return v + a - jnp.mean(a)


# ----------------------------------- Main ------------------------------------
if __name__ == "__main__":
    key = jax.random.PRNGKey(0)
    k_x, k_p = jax.random.split(key)

    batch = 2
    num_inputs = 8      # state dimension
    num_outputs = 6     # number of actions

    x = jax.random.normal(k_x, (batch, num_inputs), dtype=jnp.float32)
    params = make_params(k_p, num_inputs, num_outputs)
    fused = fuse_params(params, num_outputs)

    out = dueling_dqn_forward(x, fused, num_outputs=num_outputs)
    out = jax.block_until_ready(out)

    ref = reference_forward(x, params)
    assert out.shape == (batch, num_outputs)
    assert jnp.allclose(out, ref, atol=1e-4, rtol=1e-4), "mismatch vs reference"

    print("KERNEL_OK")
</pallas_src>

<mosaic_0001>
module attributes {stable_mosaic.version = 11 : i64} {
  func.func @dueling_dqn_kernel(%arg0: memref<8x8xf32, #tpu.memory_space<vmem>>, %arg1: memref<8x128xf32, #tpu.memory_space<vmem>>, %arg2: memref<128x256xf32, #tpu.memory_space<vmem>>, %arg3: memref<256x128xf32, #tpu.memory_space<vmem>>, %arg4: memref<1x512xf32, #tpu.memory_space<vmem>>, %arg5: memref<8x128xf32, #tpu.memory_space<vmem>>) attributes {dimension_semantics = [], scalar_prefetch = 0 : i64, scratch_operands = 0 : i64, tpu.core_type = #tpu.core_type<tc>} {
    %c0 = arith.constant 0 : index
    %c0_0 = arith.constant 0 : index
    %0 = vector.load %arg4[%c0, %c0_0] : memref<1x512xf32, #tpu.memory_space<vmem>>, vector<1x128xf32>
    %c0_1 = arith.constant 0 : index
    %c128 = arith.constant 128 : index
    %1 = vector.load %arg4[%c0_1, %c128] : memref<1x512xf32, #tpu.memory_space<vmem>>, vector<1x256xf32>
    %c0_2 = arith.constant 0 : index
    %c384 = arith.constant 384 : index
    %2 = vector.load %arg4[%c0_2, %c384] : memref<1x512xf32, #tpu.memory_space<vmem>>, vector<1x128xf32>
    %c0_3 = arith.constant 0 : index
    %c0_4 = arith.constant 0 : index
    %3 = vector.load %arg0[%c0_3, %c0_4] : memref<8x8xf32, #tpu.memory_space<vmem>>, vector<8x8xf32>
    %c0_5 = arith.constant 0 : index
    %c0_6 = arith.constant 0 : index
    %4 = vector.load %arg1[%c0_5, %c0_6] : memref<8x128xf32, #tpu.memory_space<vmem>>, vector<8x128xf32>
    %cst = arith.constant dense<0.000000e+00> : vector<8x128xf32>
    %5 = tpu.matmul %3, %4, %cst {dimension_numbers = #tpu.dot_dimension_numbers<[1], [0], [0], [1], [0, 0, 1, 1], [], []>} : vector<8x8xf32>, vector<8x128xf32>, vector<8x128xf32> -> vector<8x128xf32>
    %6 = vector.broadcast %0 : vector<1x128xf32> to vector<8x128xf32>
    %7 = arith.addf %5, %6 : vector<8x128xf32>
    %cst_7 = arith.constant 0.000000e+00 : f32
    %8 = vector.broadcast %cst_7 : f32 to vector<8x128xf32>
    %9 = arith.maximumf %7, %8 : vector<8x128xf32>
    %c0_8 = arith.constant 0 : index
    %c0_9 = arith.constant 0 : index
    %10 = vector.load %arg2[%c0_8, %c0_9] : memref<128x256xf32, #tpu.memory_space<vmem>>, vector<128x256xf32>
    %cst_10 = arith.constant dense<0.000000e+00> : vector<8x256xf32>
    %11 = tpu.matmul %9, %10, %cst_10 {dimension_numbers = #tpu.dot_dimension_numbers<[1], [0], [0], [1], [0, 0, 1, 1], [], []>} : vector<8x128xf32>, vector<128x256xf32>, vector<8x256xf32> -> vector<8x256xf32>
    %12 = vector.broadcast %1 : vector<1x256xf32> to vector<8x256xf32>
    %13 = arith.addf %11, %12 : vector<8x256xf32>
    %cst_11 = arith.constant 0.000000e+00 : f32
    %14 = vector.broadcast %cst_11 : f32 to vector<8x256xf32>
    %15 = arith.maximumf %13, %14 : vector<8x256xf32>
    %c0_12 = arith.constant 0 : index
    %c0_13 = arith.constant 0 : index
    %16 = vector.load %arg3[%c0_12, %c0_13] : memref<256x128xf32, #tpu.memory_space<vmem>>, vector<256x128xf32>
    %cst_14 = arith.constant dense<0.000000e+00> : vector<8x128xf32>
    %17 = tpu.matmul %15, %16, %cst_14 {dimension_numbers = #tpu.dot_dimension_numbers<[1], [0], [0], [1], [0, 0, 1, 1], [], []>} : vector<8x256xf32>, vector<256x128xf32>, vector<8x128xf32> -> vector<8x128xf32>
    %18 = vector.broadcast %2 : vector<1x128xf32> to vector<8x128xf32>
    %19 = arith.addf %17, %18 : vector<8x128xf32>
    %20 = tpu.iota {dimensions = array<i32: 0>} : vector<8x128xi32>
    %21 = tpu.iota {dimensions = array<i32: 1>} : vector<8x128xi32>
    %c2_i32 = arith.constant 2 : i32
    %22 = vector.broadcast %c2_i32 : i32 to vector<8x128xi32>
    %23 = arith.cmpi slt, %20, %22 : vector<8x128xi32>
    %c6_i32 = arith.constant 6 : i32
    %24 = vector.broadcast %c6_i32 : i32 to vector<8x128xi32>
    %25 = arith.cmpi slt, %21, %24 : vector<8x128xi32>
    %26 = arith.andi %23, %25 : vector<8x128xi1>
    %c127_i32 = arith.constant 127 : i32
    %27 = vector.broadcast %c127_i32 : i32 to vector<8x128xi32>
    %28 = arith.cmpi eq, %21, %27 : vector<8x128xi32>
    %29 = arith.andi %23, %28 : vector<8x128xi1>
    %30 = arith.extui %26 : vector<8x128xi1> to vector<8x128xi32>
    %31 = arith.sitofp %30 : vector<8x128xi32> to vector<8x128xf32>
    %32 = arith.extui %29 : vector<8x128xi1> to vector<8x128xi32>
    %33 = arith.sitofp %32 : vector<8x128xi32> to vector<8x128xf32>
    %cst_15 = arith.constant 6.000000e+00 : f32
    %34 = vector.broadcast %cst_15 : f32 to vector<8x128xf32>
    %35 = arith.mulf %34, %33 : vector<8x128xf32>
    %36 = arith.subf %31, %35 : vector<8x128xf32>
    %37 = arith.mulf %19, %36 : vector<8x128xf32>
    %38 = vector.shape_cast %37 : vector<8x128xf32> to vector<1x8x128xf32>
    %cst_16 = arith.constant dense<0.000000e+00> : vector<1xf32>
    %39 = vector.multi_reduction <add>, %38, %cst_16 [1, 2] : vector<1x8x128xf32> to vector<1xf32>
    %40 = vector.shape_cast %39 : vector<1xf32> to vector<1x1x1xf32>
    %41 = vector.extract %40[0, 0, 0] : f32 from vector<1x1x1xf32>
    %cst_17 = arith.constant 1.200000e+01 : f32
    %42 = arith.divf %41, %cst_17 : f32
    %43 = vector.broadcast %42 : f32 to vector<8x128xf32>
    %44 = arith.subf %19, %43 : vector<8x128xf32>
    %c0_18 = arith.constant 0 : index
    %c0_19 = arith.constant 0 : index
    %45 = vector.load %arg5[%c0_18, %c0_19] : memref<8x128xf32, #tpu.memory_space<vmem>>, vector<8x128xf32>
    tpu.vector_store %arg5[%c0_18, %c0_19], %44 {strides = array<i32>} : memref<8x128xf32, #tpu.memory_space<vmem>>, vector<8x128xf32>,
    return
  }
}

</mosaic_0001>

<bundles_post_ra>
// kernel: tpu_custom_call.1
= control target key start
LH: loop header
LB: loop body
LE: loop exit
PB: predicated region body
PF: predicated region fallthrough
CT: control target
= control target key end

     0   :  { %10 = vsyncpa [#allocation3], 0  ;;  %s668_s0 = inlined_call_operand.hbm [shape: f32[8,8], index: 0, kind: input, shape index: {}]   ;;  %s669_s1 = inlined_call_operand.hbm [shape: f32[8,128], index: 1, kind: input, shape index: {}]   ;;  %s670_s2 = inlined_call_operand.hbm [shape: f32[128,256], index: 2, kind: input, shape index: {}]   ;;  %s671_s3 = inlined_call_operand.hbm [shape: f32[256,128], index: 3, kind: input, shape index: {}]   ;;  %s672_s4 = inlined_call_operand.vmem [shape: f32[1,512], index: 4, kind: input, shape index: {}]   ;;  %s673_s5 = inlined_call_operand.hbm [shape: f32[8,128], index: 5, kind: output, shape index: {}]  }
   0x1   :  { %11 = vsyncpa [#allocation6], 0 }
   0x2   :  { %12 = vsyncpa [#allocation9], 0 }
   0x3   :  { %13 = vsyncpa [#allocation4], 0  ;;  %s598_s18 = smov [#allocation5]   ;;  %s599_s20 = smov [#allocation2]  }
   0x4   :  { %s30_s19 = sshll.u32 %s598_s18, 4  ;;  %s20_s21 = sshll.u32 %s599_s20, 4  ;;  %s31_s19 = int_to_ptr.vmem [resolvable:$true] %s30_s19  ;;  %s21_s21 = int_to_ptr.vmem [resolvable:$true] %s20_s21 }
   0x5   :  { %s498_s22 = scalar_lea.vmem %s31_s19, 128  ;;  %p503_p1 = scmp.lt.s32.totalorder %s31_s19, %s31_s19 }
   0x6   :  { %p499_p0 = scmp.ne.s32.totalorder %s31_s19, %s498_s22  ;;  %p504_p2 = scmp.lt.s32.totalorder %s498_s22, %s498_s22 }
   0x8   :  { %p505_p3 = por %p504_p2, %p503_p1 }
   0xa   :  { %p506_p4 = pnand %p505_p3, %p499_p0 }
   0xc   :  { %509 = shalt.err (!%p506_p4)
}
   0xd   :  { %33 = dma.hbm_to_vmem [thread:$0]  %s669_s1, 128, %s31_s19, [#allocation6]  }
   0xe   :  { %s518_s25 = scalar_lea.vmem %s21_s21, 128  ;;  %p523_p6 = scmp.lt.s32.totalorder %s21_s21, %s21_s21 }
   0xf   :  { %p519_p5 = scmp.ne.s32.totalorder %s21_s21, %s518_s25  ;;  %p524_p7 = scmp.lt.s32.totalorder %s518_s25, %s518_s25 }
  0x11   :  { %p525_p8 = por %p524_p7, %p523_p6 }
  0x13   :  { %p526_p9 = pnand %p525_p8, %p519_p5 }
  0x15   :  { %529 = shalt.err (!%p526_p9)
}
  0x16   :  { %23 = dma.hbm_to_vmem [thread:$0]  %s668_s0, 128, %s21_s21, [#allocation3]  }
  0x17   :  { %s600_s28 = smov [#allocation7]  }
  0x18   :  { %s39_s29 = sshll.u32 %s600_s28, 4  ;;  %s40_s29 = int_to_ptr.vmem [resolvable:$true] %s39_s29 }
  0x19   :  { %s538_s30 = scalar_lea.vmem %s40_s29, 4096  ;;  %p543_p11 = scmp.lt.s32.totalorder %s40_s29, %s40_s29 }
  0x1a   :  { %p539_p10 = scmp.ne.s32.totalorder %s40_s29, %s538_s30  ;;  %p544_p12 = scmp.lt.s32.totalorder %s538_s30, %s538_s30 }
  0x1c   :  { %p545_p13 = por %p544_p12, %p543_p11 }
  0x1e   :  { %p546_p0 = pnand %p545_p13, %p539_p10 }
  0x20   :  { %549 = shalt.err (!%p546_p0)
}
  0x21   :  { %s601_s1 = smov 256   ;;  %s602_s6 = smov 16  }
  0x22   :  { %45 = dma.hbm_to_vmem [thread:$0]  %s670_s2, 4096, %s40_s29, [#allocation6], %s601_s1, %s601_s1, %s602_s6  }
  0x23   :  { %s603_s9 = smov [#allocation8]  }
  0x24   :  { %s51_s10 = sshll.u32 %s603_s9, 4  ;;  %s52_s10 = int_to_ptr.vmem [resolvable:$true] %s51_s10 }
  0x25   :  { %s558_s0 = scalar_lea.vmem %s52_s10, 4096  ;;  %p563_p2 = scmp.lt.s32.totalorder %s52_s10, %s52_s10 }
  0x26   :  { %p559_p1 = scmp.ne.s32.totalorder %s52_s10, %s558_s0  ;;  %p564_p3 = scmp.lt.s32.totalorder %s558_s0, %s558_s0 }
  0x28   :  { %p565_p4 = por %p564_p3, %p563_p2 }
  0x2a   :  { %p566_p5 = pnand %p565_p4, %p559_p1 }
  0x2c   :  { %569 = shalt.err (!%p566_p5)
}
  0x2d   :  { %s604_s11 = smov 128   ;;  %s605_s12 = smov 8  }
  0x2e   :  { %57 = dma.hbm_to_vmem [thread:$0]  %s671_s3, 4096, %s52_s10, [#allocation9], %s604_s11, %s604_s11, %s605_s12  }
  0x2f   :  { %590 = dma.done.wait [#allocation3], 128  }
  0x30   :  { %591 = vsyncadd [#allocation3], 4294967168 }
  0x31   :  { %592 = dma.done.wait [#allocation6], 4224  }
  0x32   :  { %593 = vsyncadd [#allocation6], 4294963072 }
  0x33   :  { %594 = dma.done.wait [#allocation9], 4096  }
  0x34   :  { %595 = vsyncadd [#allocation9], 4294963200  ;;  %v606_v0 = vmov 0.0   ;;  %vm607_vm0 = vmmov 0   ;;  %vm83_vm1 = vcmask 64512   ;;  %v76_v1 = vld [vmem:[#allocation5] sm:$0xff] }
  0x35   :  { %472 = vmatprep.subr.mxu0 %v606_v0  ;;  %474 = vmatprep.mubr.msk.f32.mxu0 %vm607_vm0, %v606_v0  ;;  %v75_v2 = vld [vmem:[#allocation2] sm:$0xff]  ;;  %v189_v3 = vld [vmem:[#allocation7 + $0xf8] sm:$0xff]  ;;  %v187_v5 = vld [vmem:[#allocation7 + $0xe8] sm:$0xff]  ;;  %s608_s21 = smov [#allocation10]  }
  0x36   :  { %265 = vmatprep.mubr.f32.mxu1 %v606_v0  ;;  %473 = vmatpush3.msra.mxu0 %v76_v1  ;;  %v188_v4 = vld [vmem:[#allocation7 + $0xf0] sm:$0xff]  ;;  %v186_v6 = vld [vmem:[#allocation7 + $0xe0] sm:$0xff]  ;;  %v185_v7 = vld [vmem:[#allocation7 + $0xd8] sm:$0xff]  ;;  %s419_s22 = sshll.u32 %s608_s21, 4  ;;  %s420_s22 = int_to_ptr.vmem [resolvable:$true] %s419_s22 }
  0x37   :  { %201 = vmatprep.subr.mxu1 %v189_v3  ;;  %475 = vmatmul.mubr.msk.f32.vlgmr.msra.gmra.mxu0 %vm83_vm1, %v75_v2  ;;  %v184_v8 = vld [vmem:[#allocation7 + $0xd0] sm:$0xff]  ;;  %v183_v9 = vld [vmem:[#allocation7 + $0xc8] sm:$0xff]  ;;  %v182_v10 = vld [vmem:[#allocation7 + $0xc0] sm:$0xff]  ;;  %p575_p7 = scmp.lt.s32.totalorder %s420_s22, %s420_s22 }
  0x38   :  { %202 = vmatpush1.msra.mxu1 %v188_v4  ;;  %v181_v11 = vld [vmem:[#allocation7 + $0xb8] sm:$0xff]  ;;  %v180_v12 = vld [vmem:[#allocation7 + $0xb0] sm:$0xff]  ;;  %v179_v13 = vld [vmem:[#allocation7 + $0xa8] sm:$0xff] }
  0x39   :  { %203 = vmatprep.subr.mxu1 %v187_v5  ;;  %v178_v14 = vld [vmem:[#allocation7 + $0xa0] sm:$0xff]  ;;  %v177_v15 = vld [vmem:[#allocation7 + $0x98] sm:$0xff]  ;;  %v176_v16 = vld [vmem:[#allocation7 + $0x90] sm:$0xff] }
  0x3a   :  { %204 = vmatpush1.msra.mxu1 %v186_v6  ;;  %v175_v17 = vld [vmem:[#allocation7 + $0x88] sm:$0xff]  ;;  %v174_v18 = vld [vmem:[#allocation7 + $0x80] sm:$0xff]  ;;  %v173_v19 = vld [vmem:[#allocation7 + $0x78] sm:$0xff] }
  0x3b   :  { %205 = vmatprep.subr.mxu1 %v185_v7  ;;  %v172_v20 = vld [vmem:[#allocation7 + $0x70] sm:$0xff]  ;;  %v171_v21 = vld [vmem:[#allocation7 + $0x68] sm:$0xff]  ;;  %v170_v22 = vld [vmem:[#allocation7 + $0x60] sm:$0xff] }
  0x3c   :  { %206 = vmatpush1.msra.mxu1 %v184_v8  ;;  %v169_v23 = vld [vmem:[#allocation7 + $0x58] sm:$0xff]  ;;  %v168_v24 = vld [vmem:[#allocation7 + $0x50] sm:$0xff]  ;;  %v167_v25 = vld [vmem:[#allocation7 + $0x48] sm:$0xff] }
  0x3d   :  { %207 = vmatprep.subr.mxu1 %v183_v9  ;;  %v166_v26 = vld [vmem:[#allocation7 + $0x40] sm:$0xff]  ;;  %v165_v27 = vld [vmem:[#allocation7 + $0x38] sm:$0xff]  ;;  %v164_v28 = vld [vmem:[#allocation7 + $0x30] sm:$0xff]  ;;  %v191_v9 = vlaneseq }
  0x3e   :  { %208 = vmatpush1.msra.mxu1 %v182_v10  ;;  %v163_v29 = vld [vmem:[#allocation7 + $0x28] sm:$0xff]  ;;  %v162_v30 = vld [vmem:[#allocation7 + $0x20] sm:$0xff]  ;;  %v161_v31 = vld [vmem:[#allocation7 + $0x18] sm:$0xff] }
  0x3f   :  { %209 = vmatprep.subr.mxu1 %v181_v11  ;;  %v160_v32 = vld [vmem:[#allocation7 + $0x10] sm:$0xff]  ;;  %v159_v33 = vld [vmem:[#allocation7 + $0x8] sm:$0xff]  ;;  %v158_v34 = vld [vmem:[#allocation7] sm:$0xff]  ;;  %v192_v10 = vshrl.u32 %v191_v9, 7 }
  0x40   :  { %210 = vmatpush1.msra.mxu1 %v180_v12  ;;  %v305_v35 = vld [vmem:[#allocation8 + $0xf8] sm:$0xff]  ;;  %v304_v37 = vld [vmem:[#allocation8 + $0xf0] sm:$0xff]  ;;  %v303_v39 = vld [vmem:[#allocation8 + $0xe8] sm:$0xff] }
  0x41   :  { %211 = vmatprep.subr.mxu1 %v179_v13  ;;  %v289_v36 = vld [vmem:[#allocation8 + $0x78] sm:$0xff]  ;;  %437 = vmatprep.subr.mxu0 %v305_v35  ;;  %v288_v38 = vld [vmem:[#allocation8 + $0x70] sm:$0xff]  ;;  %v287_v40 = vld [vmem:[#allocation8 + $0x68] sm:$0xff]  ;;  %v193_v11 = vsub.s32 0, %v192_v10  ;;  %v197_v13 = vsub.s32 1, %v192_v10  ;;  %vm386_vm2 = vcmp.lt.s32.totalorder %v192_v10, 2 }
  0x42   :  { %212 = vmatpush1.msra.mxu1 %v178_v14  ;;  %438 = vmatpush3.msra.mxu0 %v289_v36  ;;  %v302_v41 = vld [vmem:[#allocation8 + $0xe0] sm:$0xff]  ;;  %v301_v43 = vld [vmem:[#allocation8 + $0xd8] sm:$0xff]  ;;  %v300_v45 = vld [vmem:[#allocation8 + $0xd0] sm:$0xff] }
  0x43   :  { %213 = vmatprep.subr.mxu1 %v177_v15  ;;  %439 = vmatprep.subr.mxu0 %v304_v37  ;;  %v286_v42 = vld [vmem:[#allocation8 + $0x60] sm:$0xff]  ;;  %v285_v44 = vld [vmem:[#allocation8 + $0x58] sm:$0xff]  ;;  %v284_v46 = vld [vmem:[#allocation8 + $0x50] sm:$0xff] }
  0x44   :  { %214 = vmatpush1.msra.mxu1 %v176_v16  ;;  %440 = vmatpush3.msra.mxu0 %v288_v38  ;;  %v299_v47 = vld [vmem:[#allocation8 + $0xc8] sm:$0xff]  ;;  %v298_v49 = vld [vmem:[#allocation8 + $0xc0] sm:$0xff]  ;;  %v297_v51 = vld [vmem:[#allocation8 + $0xb8] sm:$0xff] }
  0x45   :  { %215 = vmatprep.subr.mxu1 %v175_v17  ;;  %441 = vmatprep.subr.mxu0 %v303_v39  ;;  %v283_v48 = vld [vmem:[#allocation8 + $0x48] sm:$0xff]  ;;  %v282_v50 = vld [vmem:[#allocation8 + $0x40] sm:$0xff]  ;;  %v281_v52 = vld [vmem:[#allocation8 + $0x38] sm:$0xff] }
  0x46   :  { %216 = vmatpush1.msra.mxu1 %v174_v18  ;;  %442 = vmatpush3.msra.mxu0 %v287_v40  ;;  %v296_v53 = vld [vmem:[#allocation8 + $0xb0] sm:$0xff]  ;;  %v295_v55 = vld [vmem:[#allocation8 + $0xa8] sm:$0xff]  ;;  %v294_v57 = vld [vmem:[#allocation8 + $0xa0] sm:$0xff] }
  0x47   :  { %217 = vmatprep.subr.mxu1 %v173_v19  ;;  %443 = vmatprep.subr.mxu0 %v302_v41  ;;  %v280_v54 = vld [vmem:[#allocation8 + $0x30] sm:$0xff]  ;;  %v279_v56 = vld [vmem:[#allocation8 + $0x28] sm:$0xff]  ;;  %v278_v58 = vld [vmem:[#allocation8 + $0x20] sm:$0xff] }
  0x48   :  { %218 = vmatpush1.msra.mxu1 %v172_v20  ;;  %444 = vmatpush3.msra.mxu0 %v286_v42  ;;  %v430_v59 = vld [vmem:[%s672_s4] ss:$0 sm:$0xff]  ;;  %v293_v1 = vld [vmem:[#allocation8 + $0x98] sm:$0xff]  ;;  %v291_v5 = vld [vmem:[#allocation8 + $0x88] sm:$0xff] }
  0x49   :  { %219 = vmatprep.subr.mxu1 %v171_v21  ;;  %445 = vmatprep.subr.mxu0 %v301_v43  ;;  %v277_v2 = vld [vmem:[#allocation8 + $0x18] sm:$0xff]  ;;  %v292_v3 = vld [vmem:[#allocation8 + $0x90] sm:$0xff]  ;;  %v275_v6 = vld [vmem:[#allocation8 + $0x8] sm:$0xff] }
  0x4a   :  { %220 = vmatpush1.msra.mxu1 %v170_v22  ;;  %446 = vmatpush3.msra.mxu0 %v285_v44  ;;  %v276_v4 = vld [vmem:[#allocation8 + $0x10] sm:$0xff]  ;;  %v290_v7 = vld [vmem:[#allocation8 + $0x80] sm:$0xff]  ;;  %v385_v22 = vand.u32 127, %v191_v9 }
  0x4b   :  { %221 = vmatprep.subr.mxu1 %v169_v23  ;;  %447 = vmatprep.subr.mxu0 %v300_v45  ;;  %v274_v8 = vld [vmem:[#allocation8] sm:$0xff]  ;;  %v73_v12 = vld [vmem:[%s672_s4 + $0x1] sm:$0x3] }
  0x4c   :  { %222 = vmatpush1.msra.mxu1 %v168_v24  ;;  %448 = vmatpush3.msra.mxu0 %v284_v46  ;;  %v194_v14 = vrot.slane %v73_v12, %v193_v11  ;;  %v198_v15 = vrot.slane %v73_v12, %v197_v13  ;;  %vm389_vm3 = vcmp.eq.s32.totalorder %v385_v22, 127  ;;  %vm387_vm5 = vcmp.lt.s32.totalorder %v385_v22, 6 }
  0x4d   :  { %223 = vmatprep.subr.mxu1 %v167_v25  ;;  %449 = vmatprep.subr.mxu0 %v299_v47  ;;  %vm390_vm4 = vmand %vm386_vm2, %vm389_vm3 }
  0x4e   :  { %224 = vmatpush1.msra.mxu1 %v166_v26  ;;  %450 = vmatpush3.msra.mxu0 %v283_v48  ;;  %v434_v23 = vsel %vm390_vm4, 1.0, %v606_v0  ;;  %vm388_vm6 = vmand %vm386_vm2, %vm387_vm5 }
  0x4f   :  { %225 = vmatprep.subr.mxu1 %v165_v27  ;;  %451 = vmatprep.subr.mxu0 %v298_v49  ;;  %v395_v24 = vmul.f32 6.0, %v434_v23  ;;  %v433_v26 = vsel %vm388_vm6, 1.0, %v606_v0 }
  0x50   :  { %226 = vmatpush1.msra.mxu1 %v164_v28  ;;  %452 = vmatpush3.msra.mxu0 %v282_v50  ;;  %v432_v28 = vld [vmem:[%s672_s4 + $0x3] ss:$0 sm:$0xff]  ;;  %s570_s4 = scalar_lea.vmem %s420_s22, 128 }
  0x51   :  { %227 = vmatprep.subr.mxu1 %v163_v29  ;;  %453 = vmatprep.subr.mxu0 %v297_v51  ;;  %p571_p6 = scmp.ne.s32.totalorder %s420_s22, %s570_s4  ;;  %p576_p8 = scmp.lt.s32.totalorder %s570_s4, %s570_s4 }
  0x52   :  { %228 = vmatpush1.msra.mxu1 %v162_v30  ;;  %454 = vmatpush3.msra.mxu0 %v281_v52  ;;  %v396_v30 = vsub.f32 %v433_v26, %v395_v24 }
  0x53   :  { %229 = vmatprep.subr.mxu1 %v161_v31  ;;  %455 = vmatprep.subr.mxu0 %v296_v53  ;;  %p577_p9 = por %p576_p8, %p575_p7 }
  0x54   :  { %230 = vmatpush1.msra.mxu1 %v160_v32  ;;  %456 = vmatpush3.msra.mxu0 %v280_v54 }
  0x55   :  { %231 = vmatprep.subr.mxu1 %v159_v33  ;;  %457 = vmatprep.subr.mxu0 %v295_v55  ;;  %p578_p10 = pnand %p577_p9, %p571_p6 }
  0x56   :  { %232 = vmatpush1.msra.mxu1 %v158_v34  ;;  %458 = vmatpush3.msra.mxu0 %v279_v56 }
  0x57   :  { %459 = vmatprep.subr.mxu0 %v294_v57 }
  0x58   :  { %460 = vmatpush3.msra.mxu0 %v278_v58 }
  0x59   :  { %461 = vmatprep.subr.mxu0 %v293_v1 }
  0x5a   :  { %462 = vmatpush3.msra.mxu0 %v277_v2 }
  0x5b   :  { %463 = vmatprep.subr.mxu0 %v292_v3 }
  0x5c   :  { %464 = vmatpush3.msra.mxu0 %v276_v4 }
  0x5d   :  { %465 = vmatprep.subr.mxu0 %v291_v5 }
  0x5e   :  { %466 = vmatpush3.msra.mxu0 %v275_v6 }
  0x5f   :  { %467 = vmatprep.subr.mxu0 %v290_v7 }
  0x60   :  { %468 = vmatpush3.msra.mxu0 %v274_v8 }
  0xf7   :  { %v153_v60 = vpop.f32.mrf.mxu0 }
  0xf8   :  { %v154_v61 = vadd.f32 %v430_v59, %v153_v60 }
  0xf9   :  { %v476_v62 = vpop.f32.mrf.mxu0 }
  0xfa   :  { %v157_v63 = vmax.f32 %v154_v61, 0.0 }
  0xfc   :  { %266 = vmatmul.mubr.f32.vlgmr.msra.gmra.mxu1 %v157_v63 }
 0x1bc   :  { %v267_v16 = vpop.f32.mrf.mxu1 }
 0x1bd   :  { %v268_v17 = vadd.f32 %v267_v16, %v194_v14 }
 0x1be   :  { %v269_v18 = vpop.f32.mrf.mxu1 }
 0x1bf   :  { %v270_v19 = vadd.f32 %v269_v18, %v198_v15  ;;  %v272_v21 = vmax.f32 %v268_v17, 0.0 }
 0x1c1   :  { %v273_v20 = vmax.f32 %v270_v19, 0.0 }
 0x1c3   :  { %376 = vmatprep.mubr.f32.mxu0 %v273_v20 }
 0x1c4   :  { %377 = vmatmul.mubr.f32.vlgmr.msra.gmra.mxu0 %v272_v21 }
 0x284   :  { %v469_v25 = vpop.f32.mrf.mxu0 }
 0x286   :  { %v470_v27 = vpop.f32.mrf.mxu0 }
 0x287   :  { %v471_v29 = vadd.f32 %v470_v27, %v469_v25 }
 0x289   :  { %v379_v31 = vadd.f32 %v471_v29, %v432_v28 }
 0x28b   :  { %v397_v32 = vmul.f32 %v396_v30, %v379_v31 }
 0x28d   :  { %398 = vadd.xlane.f32.xlu0 %v397_v32 }
 0x316   :  { %v399_v33 = vpop.xlane.xlu0 %398 }
 0x317   :  { %v400_v34 = vrot.slane %v399_v33, 4 }
 0x319   :  { %v401_v35 = vadd.f32 %v400_v34, %v399_v33 }
 0x31b   :  { %v402_v36 = vrot.slane %v401_v35, 2 }
 0x31d   :  { %v403_v37 = vadd.f32 %v402_v36, %v401_v35 }
 0x31f   :  { %v404_v38 = vrot.slane %v403_v37, 1 }
 0x321   :  { %v405_v39 = vadd.f32 %v404_v38, %v403_v37 }
 0x323   :  { %477 = vpush %v405_v39 }
 0x354   :  { %s478_s19 = spop %477 }
 0x355   :  { %s409_s20 = smul.f32 0.083333336, %s478_s19 }
 0x357   :  { %v410_v0 = vstv %s409_s20 }
 0x358   :  { %v411_v40 = vsub.f32 %v379_v31, %v410_v0 }
 0x35a   :  { %412 = vst [vmem:[#allocation10] sm:$0xff] %v411_v40 }
 0x35b   :  { %581 = shalt.err (!%p578_p10)
}
 0x35c   :  { %422 = dma.vmem_to_hbm [thread:$0]  %s420_s22, 128, %s673_s5, [#allocation4]  }
 0x35d   :  { %596 = dma.done.wait [#allocation4], 128  }
 0x35e   :  { %597 = vsyncadd [#allocation4], 4294967168 }
 0x35f   :  { %426 = vsyncpa [#allocation3], 1 }
 0x360   :  { %427 = vsyncpa [#allocation6], 1 }
 0x361   :  { %428 = vsyncpa [#allocation9], 1 }
 0x362   :  { %429 = vsyncpa [#allocation4], 1 }

</bundles_post_ra>
